<compile_context>
chip_gen: v7x
topology: tpu7x:2x2x1
jax: 0.10.0
libtpu: 0.0.40
codegen_flags: <defaults>
</compile_context>

<pallas_src>
import functools
import math

import jax
import jax.numpy as jnp
from jax.experimental import pallas as pl
from jax.experimental.pallas import tpu as pltpu


def _round_up(x, m):
    return (x + m - 1) // m * m


def _pick_tk(k):
    """K tile: full K when small, else the largest 128-multiple divisor <= 512."""
    if k <= 512:
        return k
    for tk in (512, 384, 256, 128):
        if k % tk == 0:
            return tk
    return 128  # caller pads K up to a multiple of 128


# ---------------------------------------------------------------------------
# Pallas kernels
# ---------------------------------------------------------------------------
def _gemm_kernel(a_ref, b_ref, s_ref, c_ref, o_ref, acc_ref, *, relu):
    # a: (tm, tk) bf16   b: (tk, n) bf16   s/c: (1, n) f32   o: (tm, n)
    @pl.when(pl.program_id(1) == 0)
    def _init():
        acc_ref[...] = jnp.zeros_like(acc_ref)

    acc_ref[...] += jnp.dot(a_ref[...], b_ref[...],
                            preferred_element_type=jnp.float32)

    @pl.when(pl.program_id(1) == pl.num_programs(1) - 1)
    def _fin():
        y = acc_ref[...] * s_ref[...] + c_ref[...]
        if relu:
            y = jnp.maximum(y, 0.0)
        o_ref[...] = y.astype(o_ref.dtype)


def _gemm_res_kernel(a_ref, b_ref, s_ref, c_ref, r_ref, o_ref, acc_ref, *, relu):
    @pl.when(pl.program_id(1) == 0)
    def _init():
        acc_ref[...] = jnp.zeros_like(acc_ref)

    acc_ref[...] += jnp.dot(a_ref[...], b_ref[...],
                            preferred_element_type=jnp.float32)

    @pl.when(pl.program_id(1) == pl.num_programs(1) - 1)
    def _fin():
        y = acc_ref[...] * s_ref[...] + c_ref[...] + r_ref[...].astype(jnp.float32)
        if relu:
            y = jnp.maximum(y, 0.0)
        o_ref[...] = y.astype(o_ref.dtype)


def _maxpool_kernel(ee_ref, eo_ref, oe_ref, oo_ref, o_ref):
    # ee/eo/oe/oo: (1, Ho+1, Wo+1, C) parity views of the (-inf)-padded input.
    ho = o_ref.shape[1]
    wo = o_ref.shape[2]
    ee = ee_ref[...]
    eo = eo_ref[...]
    oe = oe_ref[...]
    oo = oo_ref[...]
    # 3-wide, stride-2 max along W (cols 2j, 2j+1, 2j+2)
    ce = jnp.maximum(jnp.maximum(ee[:, :, :wo, :], eo[:, :, :wo, :]),
                     ee[:, :, 1:wo + 1, :])
    co = jnp.maximum(jnp.maximum(oe[:, :, :wo, :], oo[:, :, :wo, :]),
                     oe[:, :, 1:wo + 1, :])
    # 3-wide, stride-2 max along H (rows 2i, 2i+1, 2i+2)
    o_ref[...] = jnp.maximum(jnp.maximum(ce[:, :ho, :, :], co[:, :ho, :, :]),
                             ce[:, 1:ho + 1, :, :])


def _upsample_add_kernel(f_ref, c_ref, o_ref):
    # f: (1, 2, W/2, 2C) two fine rows, W-pairs packed on lanes
    # c: (1, 1, W/2,  C) one coarse row
    f = f_ref[...].astype(jnp.float32)
    c = c_ref[...].astype(jnp.float32)
    # W nearest-upsample == lane concat in the packed layout; H upsample via the
    # size-1 leading-dim broadcast (both fine rows see the same coarse row).
    cc = jnp.concatenate([c, c], axis=-1)
    o_ref[...] = (f + cc).astype(o_ref.dtype)


# ---------------------------------------------------------------------------
# Pallas wrappers
# ---------------------------------------------------------------------------
def _fused_gemm(a, b, scale, bias, *, residual=None, relu=False,
                out_dtype=jnp.bfloat16, tm=512):
    """out = act((a @ b) * scale + bias [+ residual]); bf16 inputs, f32 acc."""
    m, k = a.shape
    kb, n = b.shape
    assert k == kb
    a = a.astype(jnp.bfloat16)
    b = b.astype(jnp.bfloat16)
    scale = scale.reshape(1, n).astype(jnp.float32)
    bias = bias.reshape(1, n).astype(jnp.float32)

    tm = min(tm, _round_up(m, 8))
    mp = _round_up(m, tm)
    if mp != m:
        a = jnp.pad(a, ((0, mp - m), (0, 0)))
        if residual is not None:
            residual = jnp.pad(residual, ((0, mp - m), (0, 0)))

    tk = _pick_tk(k)
    if k % tk:
        kp = _round_up(k, tk)
        a = jnp.pad(a, ((0, 0), (0, kp - k)))
        b = jnp.pad(b, ((0, kp - k), (0, 0)))
        k = kp
    nk = k // tk

    a_spec = pl.BlockSpec((tm, tk), lambda i, j: (i, j))
    b_spec = pl.BlockSpec((tk, n), lambda i, j: (j, 0))
    v_spec = pl.BlockSpec((1, n), lambda i, j: (0, 0))
    o_spec = pl.BlockSpec((tm, n), lambda i, j: (i, 0))

    if residual is None:
        kernel = functools.partial(_gemm_kernel, relu=relu)
        in_specs = [a_spec, b_spec, v_spec, v_spec]
        args = (a, b, scale, bias)
    else:
        kernel = functools.partial(_gemm_res_kernel, relu=relu)
        in_specs = [a_spec, b_spec, v_spec, v_spec, o_spec]
        args = (a, b, scale, bias, residual)

    out = pl.pallas_call(
        kernel,
        out_shape=jax.ShapeDtypeStruct((mp, n), out_dtype),
        grid=(mp // tm, nk),
        in_specs=in_specs,
        out_specs=o_spec,
        scratch_shapes=[pltpu.VMEM((tm, n), jnp.float32)],
        compiler_params=pltpu.CompilerParams(
            dimension_semantics=("parallel", "arbitrary"),
            vmem_limit_bytes=32 * 1024 * 1024),
    )(*args)
    return out[:m]


def _im2col(x, kh, kw, stride, pad):
    if kh == 1 and kw == 1 and stride == 1 and pad == 0:
        return x, x.shape[1], x.shape[2]
    if pad:
        x = jnp.pad(x, ((0, 0), (pad, pad), (pad, pad), (0, 0)))
    _, hp, wp, _ = x.shape
    ho = (hp - kh) // stride + 1
    wo = (wp - kw) // stride + 1
    cols = []
    for di in range(kh):
        for dj in range(kw):
            cols.append(x[:, di:di + stride * (ho - 1) + 1:stride,
                            dj:dj + stride * (wo - 1) + 1:stride, :])
    patches = cols[0] if len(cols) == 1 else jnp.concatenate(cols, axis=-1)
    return patches, ho, wo


def conv_bn(x, p, *, relu, residual=None, out_dtype=jnp.bfloat16):
    """Fused conv + folded-BN (+residual) (+ReLU).  x: NHWC bf16."""
    n, h, w, cin = x.shape
    ks, stride, pad = p['ksize'], p['stride'], p['pad']
    patches, ho, wo = _im2col(x, ks, ks, stride, pad)
    m = n * ho * wo
    kdim = ks * ks * cin
    a = patches.reshape(m, kdim)
    cout = p['cout']
    r = residual
    if p['pair']:  # pack two output pixels onto lanes -> N = 2*cout = 128
        assert m % 2 == 0
        a = a.reshape(m // 2, 2 * kdim)
        if r is not None:
            r = r.reshape(m // 2, 2 * cout)
    elif r is not None:
        r = r.reshape(m, cout)
    out = _fused_gemm(a, p['b'], p['scale'], p['bias'],
                      residual=r, relu=relu, out_dtype=out_dtype)
    return out.reshape(n, ho, wo, cout)


def maxpool_3x3_s2(x):
    """PyTorch MaxPool2d(kernel_size=3, stride=2, padding=1) on NHWC (even H,W)."""
    n, h, w, c = x.shape
    neg = jnp.finfo(x.dtype).min
    xp = jnp.pad(x, ((0, 0), (1, 1), (1, 1), (0, 0)), constant_values=neg)
    ho = (h + 2 - 3) // 2 + 1
    wo = (w + 2 - 3) // 2 + 1
    ee = xp[:, 0::2, 0::2, :]
    eo = xp[:, 0::2, 1::2, :]
    oe = xp[:, 1::2, 0::2, :]
    oo = xp[:, 1::2, 1::2, :]
    he, we = ee.shape[1], ee.shape[2]
    spec = pl.BlockSpec((1, he, we, c), lambda ni: (ni, 0, 0, 0))
    return pl.pallas_call(
        _maxpool_kernel,
        out_shape=jax.ShapeDtypeStruct((n, ho, wo, c), x.dtype),
        grid=(n,),
        in_specs=[spec, spec, spec, spec],
        out_specs=pl.BlockSpec((1, ho, wo, c), lambda ni: (ni, 0, 0, 0)),
        compiler_params=pltpu.CompilerParams(
            dimension_semantics=("arbitrary",)),
    )(ee, eo, oe, oo)


def upsample_add(fine, coarse, out_dtype=jnp.float32):
    """fine + nearest_upsample_2x(coarse), fused; C must be 64, H,W even."""
    n, h, w, c = fine.shape
    assert coarse.shape == (n, h // 2, w // 2, c) and w % 2 == 0 and h % 2 == 0
    fp = fine.reshape(n, h, w // 2, 2 * c)  # free reshape: W-pairs on lanes (128)
    out = pl.pallas_call(
        _upsample_add_kernel,
        out_shape=jax.ShapeDtypeStruct((n, h, w // 2, 2 * c), out_dtype),
        grid=(n, h // 2),
        in_specs=[
            pl.BlockSpec((1, 2, w // 2, 2 * c), lambda ni, hi: (ni, hi, 0, 0)),
            pl.BlockSpec((1, 1, w // 2, c), lambda ni, hi: (ni, hi, 0, 0)),
        ],
        out_specs=pl.BlockSpec((1, 2, w // 2, 2 * c),
                               lambda ni, hi: (ni, hi, 0, 0)),
        compiler_params=pltpu.CompilerParams(
            dimension_semantics=("arbitrary", "arbitrary")),
    )(fp, coarse)
    return out.reshape(n, h, w, c)


# ---------------------------------------------------------------------------
# Parameter packing (BN folded, weights pre-packed to GEMM form, bf16)
# ---------------------------------------------------------------------------
def _pack_weight(w, groups):
    """PyTorch conv weight (cout, cin//g, kh, kw) -> GEMM weight (kk*cin, cout).

    For groups > 1 the result is block-diagonal across groups so the grouped
    conv becomes a single lane-dense GEMM (no per-group repack of activations).
    """
    cout, cpg_in, kh, kw = w.shape
    kk = kh * kw
    if groups == 1:
        return jnp.transpose(w, (2, 3, 1, 0)).reshape(kk * cpg_in, cout)
    g = groups
    cpg_out = cout // g
    wt = w.reshape(g, cpg_out, cpg_in, kk)            # (g, cpg_out, cpg_in, kk)
    wt = jnp.transpose(wt, (3, 0, 2, 1))              # (kk, g, cpg_in, cpg_out)
    eye = jnp.eye(g, dtype=w.dtype)
    bbd = jnp.einsum('tgio,gh->tgiho', wt, eye)       # (kk, g_in, cpg_in, g_out, cpg_out)
    return bbd.reshape(kk * g * cpg_in, cout)


def _pair_pack(b, scale, bias):
    """block_diag(B, B): two output pixels share one 2*cout-lane GEMM row."""
    k, n = b.shape
    z = jnp.zeros((k, n), b.dtype)
    b2 = jnp.concatenate([jnp.concatenate([b, z], axis=1),
                          jnp.concatenate([z, b], axis=1)], axis=0)
    return b2, jnp.tile(scale, 2), jnp.tile(bias, 2)


def _finalize_conv(w, scale, bias, *, ksize, stride, pad, groups):
    cout = w.shape[0]
    b = _pack_weight(w, groups)
    pair = cout < 128                      # make the 64-channel convs lane-dense
    if pair:
        b, scale, bias = _pair_pack(b, scale, bias)
    return {'b': b.astype(jnp.bfloat16),
            'scale': scale.astype(jnp.float32),
            'bias': bias.astype(jnp.float32),
            'ksize': ksize, 'stride': stride, 'pad': pad,
            'cout': cout, 'pair': pair}


def conv_bn_params(key, cin, cout, ksize, *, stride=1, pad=0, groups=1):
    k1, k2, k3, k4, k5 = jax.random.split(key, 5)
    fan_in = (cin // groups) * ksize * ksize
    w = jax.random.normal(k1, (cout, cin // groups, ksize, ksize),
                          jnp.float32) / math.sqrt(fan_in)
    gamma = 1.0 + 0.1 * jax.random.normal(k2, (cout,), jnp.float32)
    beta = 0.1 * jax.random.normal(k3, (cout,), jnp.float32)
    mean = 0.1 * jax.random.normal(k4, (cout,), jnp.float32)
    var = 1.0 + 0.1 * jax.random.uniform(k5, (cout,), jnp.float32)
    scale = gamma / jnp.sqrt(var + 1e-5)
    bias = beta - mean * scale
    return _finalize_conv(w, scale, bias, ksize=ksize, stride=stride, pad=pad,
                          groups=groups)


def conv_bias_params(key, cin, cout):
    k1, k2 = jax.random.split(key)
    w = jax.random.normal(k1, (cout, cin, 1, 1), jnp.float32) / math.sqrt(cin)
    bias = 0.1 * jax.random.normal(k2, (cout,), jnp.float32)
    scale = jnp.ones((cout,), jnp.float32)
    return _finalize_conv(w, scale, bias, ksize=1, stride=1, pad=0, groups=1)


def make_stage(key, in_ch, planes, n_blocks, stride):
    # resnext50_32x4d: groups=32, base_width=4 -> width = planes * 2
    width = int(planes * 4 / 64) * 32
    out_ch = planes * 4
    blocks = []
    for b in range(n_blocks):
        key, kc1, kc2, kc3, kd = jax.random.split(key, 5)
        s = stride if b == 0 else 1
        cin = in_ch if b == 0 else out_ch
        blk = {
            'conv1': conv_bn_params(kc1, cin, width, 1),
            'conv2': conv_bn_params(kc2, width, width, 3, stride=s, pad=1,
                                    groups=32),
            'conv3': conv_bn_params(kc3, width, out_ch, 1),
        }
        if b == 0 and (s != 1 or cin != out_ch):
            blk['down'] = conv_bn_params(kd, cin, out_ch, 1, stride=s)
        blocks.append(blk)
    return blocks


def init_params(key):
    keys = jax.random.split(key, 7)
    return {
        'stem': conv_bn_params(keys[0], 3, 64, 7, stride=2, pad=3),
        'layer1': make_stage(keys[1], 64, 64, 3, 1),     # -> 256 ch
        'layer2': make_stage(keys[2], 256, 128, 4, 2),   # -> 512 ch
        'layer3': make_stage(keys[3], 512, 256, 6, 2),   # -> 1024 ch
        'fpn_conv1': conv_bias_params(keys[4], 1024, 64),
        'fpn_conv2': conv_bias_params(keys[5], 512, 64),
        'fpn_conv3': conv_bias_params(keys[6], 256, 64),
    }


# ---------------------------------------------------------------------------
# Model forward
# ---------------------------------------------------------------------------
def bottleneck(x, p):
    identity = x
    out = conv_bn(x, p['conv1'], relu=True)            # 1x1
    out = conv_bn(out, p['conv2'], relu=True)          # 3x3, groups=32 (block-diag GEMM)
    if 'down' in p:
        identity = conv_bn(x, p['down'], relu=False)
    # 1x1 conv + BN + residual add + ReLU fused in one Pallas call
    return conv_bn(out, p['conv3'], relu=True, residual=identity)


def forward(params, x_nchw):
    x = jnp.transpose(x_nchw, (0, 2, 3, 1)).astype(jnp.bfloat16)  # NCHW -> NHWC

    # layer_1 = conv1 + bn1 + relu
    l1 = conv_bn(x, params['stem'], relu=True)                    # (N, H/2, W/2, 64)

    # layer_2 = maxpool + resnet layer1
    h = maxpool_3x3_s2(l1)
    for blk in params['layer1']:
        h = bottleneck(h, blk)
    l2 = h                                                        # (N, H/4, W/4, 256)

    # layer_3 = resnet layer2
    for blk in params['layer2']:
        h = bottleneck(h, blk)
    l3 = h                                                        # (N, H/8, W/8, 512)

    # layer_4 = resnet layer3
    for blk in params['layer3']:
        h = bottleneck(h, blk)
    l4 = h                                                        # (N, H/16, W/16, 1024)

    # FPN-style decoder: 1x1 convs, then fused (nearest-upsample + add) kernels.
    p_l4 = conv_bn(l4, params['fpn_conv1'], relu=False, out_dtype=jnp.float32)
    c_l3 = conv_bn(l3, params['fpn_conv2'], relu=False, out_dtype=jnp.float32)
    out_3 = upsample_add(c_l3, p_l4)                # conv_2(l3) + up(conv_1(l4))
    # TODO(synk): reference forward calls self.conv_1(l2) (expects 1024 in-ch) on the
    # 256-channel l2, a shape error in PyTorch; conv_3 (256->64) is the only
    # shape-consistent interpretation and is used here.
    c_l2 = conv_bn(l2, params['fpn_conv3'], relu=False, out_dtype=jnp.float32)
    out_2 = upsample_add(c_l2, out_3)
    out_1 = upsample_add(l1, out_2)                               # (N, H/2, W/2, 64)
    return jnp.transpose(out_1, (0, 3, 1, 2))                     # back to NCHW


if __name__ == "__main__":
    key = jax.random.PRNGKey(0)
    pkey, xkey = jax.random.split(key)
    params = init_params(pkey)
    x = jax.random.normal(xkey, (2, 3, 32, 32), dtype=jnp.float32)
    out = forward(params, x)
    out = jax.block_until_ready(out)
    assert out.shape == (2, 64, 16, 16), out.shape
    assert bool(jnp.all(jnp.isfinite(out)))
    print("KERNEL_OK")
</pallas_src>

<mosaic_0001>
module attributes {stable_mosaic.version = 11 : i64} {
  func.func @_gemm_kernel(%arg0: i32, %arg1: i32, %arg2: memref<256x294xbf16, #tpu.memory_space<vmem>>, %arg3: memref<294x128xbf16, #tpu.memory_space<vmem>>, %arg4: memref<1x128xf32, #tpu.memory_space<vmem>>, %arg5: memref<1x128xf32, #tpu.memory_space<vmem>>, %arg6: memref<256x128xbf16, #tpu.memory_space<vmem>>, %arg7: memref<256x128xf32, #tpu.memory_space<vmem>>) attributes {dimension_semantics = [#tpu.dimension_semantics<parallel>, #tpu.dimension_semantics<arbitrary>], iteration_bounds = array<i64: 1, 1>, scalar_prefetch = 0 : i64, scratch_operands = 1 : i64, tpu.core_type = #tpu.core_type<tc>, window_params = [{transform_indices = @transform_0, window_bounds = array<i64: 256, 294>}, {transform_indices = @transform_1, window_bounds = array<i64: 294, 128>}, {pipeline_mode = #tpu.pipeline_mode<synchronous>, transform_indices = @transform_2, window_bounds = array<i64: 1, 128>}, {pipeline_mode = #tpu.pipeline_mode<synchronous>, transform_indices = @transform_3, window_bounds = array<i64: 1, 128>}, {transform_indices = @transform_4, window_bounds = array<i64: 256, 128>}]} {
    %c0_i32 = arith.constant 0 : i32
    %0 = arith.cmpi eq, %arg1, %c0_i32 : i32
    %1 = arith.extui %0 : i1 to i32
    %c0_i32_0 = arith.constant 0 : i32
    %2 = arith.cmpi ne, %1, %c0_i32_0 : i32
    scf.if %2 {
      %cst_10 = arith.constant 0.000000e+00 : f32
      %12 = vector.broadcast %cst_10 : f32 to vector<256x128xf32>
      %c0_11 = arith.constant 0 : index
      %c0_12 = arith.constant 0 : index
      %13 = vector.load %arg7[%c0_11, %c0_12] : memref<256x128xf32, #tpu.memory_space<vmem>>, vector<256x128xf32>
      tpu.vector_store %arg7[%c0_11, %c0_12], %12 {strides = array<i32>} : memref<256x128xf32, #tpu.memory_space<vmem>>, vector<256x128xf32>,
    } else {
    }
    %c0 = arith.constant 0 : index
    %c0_1 = arith.constant 0 : index
    %3 = vector.load %arg7[%c0, %c0_1] : memref<256x128xf32, #tpu.memory_space<vmem>>, vector<256x128xf32>
    %c0_2 = arith.constant 0 : index
    %c0_3 = arith.constant 0 : index
    %4 = vector.load %arg2[%c0_2, %c0_3] : memref<256x294xbf16, #tpu.memory_space<vmem>>, vector<256x294xbf16>
    %c0_4 = arith.constant 0 : index
    %c0_5 = arith.constant 0 : index
    %5 = vector.load %arg3[%c0_4, %c0_5] : memref<294x128xbf16, #tpu.memory_space<vmem>>, vector<294x128xbf16>
    %cst = arith.constant dense<0.000000e+00> : vector<256x128xf32>
    %6 = tpu.matmul %4, %5, %cst {dimension_numbers = #tpu.dot_dimension_numbers<[1], [0], [0], [1], [0, 0, 1, 1], [], []>} : vector<256x294xbf16>, vector<294x128xbf16>, vector<256x128xf32> -> vector<256x128xf32>
    %7 = arith.addf %3, %6 : vector<256x128xf32>
    %c0_6 = arith.constant 0 : index
    %c0_7 = arith.constant 0 : index
    %8 = vector.load %arg7[%c0_6, %c0_7] : memref<256x128xf32, #tpu.memory_space<vmem>>, vector<256x128xf32>
    tpu.vector_store %arg7[%c0_6, %c0_7], %7 {strides = array<i32>} : memref<256x128xf32, #tpu.memory_space<vmem>>, vector<256x128xf32>,
    %c0_i32_8 = arith.constant 0 : i32
    %9 = arith.cmpi eq, %arg1, %c0_i32_8 : i32
    %10 = arith.extui %9 : i1 to i32
    %c0_i32_9 = arith.constant 0 : i32
    %11 = arith.cmpi ne, %10, %c0_i32_9 : i32
    scf.if %11 {
      %c0_10 = arith.constant 0 : index
      %c0_11 = arith.constant 0 : index
      %12 = vector.load %arg7[%c0_10, %c0_11] : memref<256x128xf32, #tpu.memory_space<vmem>>, vector<256x128xf32>
      %c0_12 = arith.constant 0 : index
      %c0_13 = arith.constant 0 : index
      %13 = vector.load %arg4[%c0_12, %c0_13] : memref<1x128xf32, #tpu.memory_space<vmem>>, vector<1x128xf32>
      %14 = vector.broadcast %13 : vector<1x128xf32> to vector<256x128xf32>
      %15 = arith.mulf %12, %14 : vector<256x128xf32>
      %c0_14 = arith.constant 0 : index
      %c0_15 = arith.constant 0 : index
      %16 = vector.load %arg5[%c0_14, %c0_15] : memref<1x128xf32, #tpu.memory_space<vmem>>, vector<1x128xf32>
      %17 = vector.broadcast %16 : vector<1x128xf32> to vector<256x128xf32>
      %18 = arith.addf %15, %17 : vector<256x128xf32>
      %cst_16 = arith.constant 0.000000e+00 : f32
      %19 = vector.broadcast %cst_16 : f32 to vector<256x128xf32>
      %20 = arith.maximumf %18, %19 : vector<256x128xf32>
      %21 = arith.truncf %20 : vector<256x128xf32> to vector<256x128xbf16>
      %c0_17 = arith.constant 0 : index
      %c0_18 = arith.constant 0 : index
      %22 = vector.load %arg6[%c0_17, %c0_18] : memref<256x128xbf16, #tpu.memory_space<vmem>>, vector<256x128xbf16>
      tpu.vector_store %arg6[%c0_17, %c0_18], %21 {strides = array<i32>} : memref<256x128xbf16, #tpu.memory_space<vmem>>, vector<256x128xbf16>,
    } else {
    }
    return
  }
  func.func @transform_0(%arg0: i32, %arg1: i32) -> (i32, i32) {
    %c0_i32 = arith.constant 0 : i32
    return %arg0, %arg1 : i32, i32
  }
  func.func @transform_1(%arg0: i32, %arg1: i32) -> (i32, i32) {
    %c0_i32 = arith.constant 0 : i32
    %c0_i32_0 = arith.constant 0 : i32
    return %arg1, %c0_i32 : i32, i32
  }
  func.func @transform_2(%arg0: i32, %arg1: i32) -> (i32, i32) {
    %c0_i32 = arith.constant 0 : i32
    %c0_i32_0 = arith.constant 0 : i32
    %c0_i32_1 = arith.constant 0 : i32
    return %c0_i32, %c0_i32_0 : i32, i32
  }
  func.func @transform_3(%arg0: i32, %arg1: i32) -> (i32, i32) {
    %c0_i32 = arith.constant 0 : i32
    %c0_i32_0 = arith.constant 0 : i32
    %c0_i32_1 = arith.constant 0 : i32
    return %c0_i32, %c0_i32_0 : i32, i32
  }
  func.func @transform_4(%arg0: i32, %arg1: i32) -> (i32, i32) {
    %c0_i32 = arith.constant 0 : i32
    %c0_i32_0 = arith.constant 0 : i32
    return %arg0, %c0_i32 : i32, i32
  }
}

</mosaic_0001>

<bundles_post_ra>
// kernel: tpu_custom_call.1
= control target key start
LH: loop header
LB: loop body
LE: loop exit
PB: predicated region body
PF: predicated region fallthrough
CT: control target
= control target key end

     0   :  { %vm588_vm0 = vcmask 1042432   ;;  %vm539_vm1 = vcmask 310272   ;;  %s2200_s0 = inlined_call_operand.vmem [shape: bf16[256,294], index: 0, kind: input, shape index: {}]   ;;  %s2201_s1 = inlined_call_operand.vmem [shape: bf16[294,128], index: 1, kind: input, shape index: {}]   ;;  %s2202_s2 = inlined_call_operand.vmem [shape: f32[1,128], index: 2, kind: input, shape index: {}]   ;;  %s2203_s3 = inlined_call_operand.vmem [shape: f32[1,128], index: 3, kind: input, shape index: {}]   ;;  %s2204_s4 = inlined_call_operand.hbm [shape: bf16[256,128], index: 4, kind: output, shape index: {}]  }
   0x1   :  { %v1732_v0 = vld [vmem:[%s2201_s1 + $0x40] sm:$0xff]   ;;  %v1734_v2 = vld [vmem:[%s2201_s1 + $0x48] sm:$0xff]   ;;  %v1736_v4 = vld [vmem:[%s2201_s1 + $0x50] sm:$0xff]  }
   0x2   :  { %v1733_v1 = vld [vmem:[%s2201_s1] sm:$0xff]   ;;  %1543 = vmatprep.subr.bf16.mxu0 %v1732_v0  ;;  %1712 = vmatprep.subr.bf16.mxu1 %v1732_v0  ;;  %v1735_v3 = vld [vmem:[%s2201_s1 + $0x8] sm:$0xff]   ;;  %v1737_v5 = vld [vmem:[%s2201_s1 + $0x10] sm:$0xff]  }
   0x3   :  { %1544 = vmatpush3.bf16.msra.mxu0 %v1733_v1  ;;  %1720 = vmatpush3.bf16.msra.mxu1 %v1733_v1  ;;  %v1738_v6 = vld [vmem:[%s2201_s1 + $0x58] sm:$0xff]   ;;  %v1740_v8 = vld [vmem:[%s2201_s1 + $0x60] sm:$0xff]   ;;  %v1742_v10 = vld [vmem:[%s2201_s1 + $0x68] sm:$0xff]  }
   0x4   :  { %1545 = vmatprep.subr.bf16.mxu0 %v1734_v2  ;;  %1713 = vmatprep.subr.bf16.mxu1 %v1734_v2  ;;  %v1739_v7 = vld [vmem:[%s2201_s1 + $0x18] sm:$0xff]   ;;  %v1741_v9 = vld [vmem:[%s2201_s1 + $0x20] sm:$0xff]   ;;  %v1743_v13 = vld [vmem:[%s2201_s1 + $0x28] sm:$0xff]  }
   0x5   :  { %v1750_v11 = vld [vmem:[%s2200_s0 + $0x4] ss:$12 sps:$4 sm:$0xff]   ;;  %v1746_v16 = vld [vmem:[%s2201_s1 + $0x78] sm:$0xff]   ;;  %v1748_v19 = vld [vmem:[%s2200_s0] ss:$12 sps:$4 sm:$0xff]  }
   0x6   :  { %v1753_v12 = vld [vmem:[%s2200_s0 + $0x124] ss:$12 sps:$4 sm:$0xff]   ;;  %624 = vmatprep.mubr.bf16.mxu0 %v1750_v11  ;;  %v1747_v17 = vld [vmem:[%s2201_s1 + $0x38] sm:$0xff]   ;;  %v1751_v20 = vld [vmem:[%s2200_s0 + $0x120] ss:$12 sps:$4 sm:$0xff]  }
   0x7   :  { %1546 = vmatpush3.bf16.msra.mxu0 %v1735_v3  ;;  %1721 = vmatpush3.bf16.msra.mxu1 %v1735_v3  ;;  %v1744_v14 = vld [vmem:[%s2201_s1 + $0x70] sm:$0xff]   ;;  %v1754_v18 = vld [vmem:[%s2201_s1 + $0x80] sm:$0xff]   ;;  %v1755_v21 = vld [vmem:[%s2200_s0 + $0x1c] ss:$12 sps:$4 sm:$0xff]  }
   0x8   :  { %1547 = vmatprep.subr.bf16.mxu0 %v1736_v4  ;;  %1714 = vmatprep.subr.bf16.mxu1 %v1736_v4  ;;  %v1745_v15 = vld [vmem:[%s2201_s1 + $0x30] sm:$0xff]   ;;  %v1757_v22 = vld [vmem:[%s2200_s0 + $0x13c] ss:$12 sps:$4 sm:$0xff]   ;;  %v1759_v24 = vld [vmem:[%s2200_s0 + $0x18] ss:$12 sps:$4 sm:$0xff]  }
   0x9   :  { %720 = vmatprep.mubr.bf16.mxu1 %v1753_v12  ;;  %v1761_v23 = vld [vmem:[%s2201_s1 + $0x88] sm:$0xff]   ;;  %v1772_v25 = vld [vmem:[%s2201_s1 + $0x90] ss:$0 sps:$4 sm:$0x77]   ;;  %v1760_v26 = vld [vmem:[%s2200_s0 + $0x138] ss:$12 sps:$4 sm:$0xff]  }
   0xa   :  { %v1762_v27 = vld [vmem:[%s2200_s0 + $0x34] ss:$12 sps:$4 sm:$0xff]   ;;  %v590_v29 = vsel %vm588_vm0, %v1772_v25, 0  ;;  %v1766_v30 = vld [vmem:[%s2200_s0 + $0x30] ss:$12 sps:$4 sm:$0xff]  }
   0xb   :  { %1548 = vmatpush3.bf16.msra.mxu0 %v1737_v5  ;;  %1722 = vmatpush3.bf16.msra.mxu1 %v1737_v5  ;;  %v1764_v28 = vld [vmem:[%s2200_s0 + $0x154] ss:$12 sps:$4 sm:$0xff]   ;;  %v1767_v31 = vld [vmem:[%s2200_s0 + $0x150] ss:$12 sps:$4 sm:$0xff]   ;;  %v1768_v32 = vld [vmem:[%s2200_s0 + $0x4c] ss:$12 sps:$4 sm:$0xff]  }
   0xc   :  { %1549 = vmatprep.subr.bf16.mxu0 %v1738_v6  ;;  %1715 = vmatprep.subr.bf16.mxu1 %v1738_v6  ;;  %v1770_v33 = vld [vmem:[%s2200_s0 + $0x16c] ss:$12 sps:$4 sm:$0xff]   ;;  %v1773_v34 = vld [vmem:[%s2200_s0 + $0x48] ss:$12 sps:$4 sm:$0xff]   ;;  %v1775_v36 = vld [vmem:[%s2200_s0 + $0x64] ss:$12 sps:$4 sm:$0xff]  }
   0xd   :  { %v1774_v35 = vld [vmem:[%s2200_s0 + $0x168] ss:$12 sps:$4 sm:$0xff]  }
   0xe   :  { %v1777_v37 = vld [vmem:[%s2200_s0 + $0x8] ss:$12 sps:$4 sm:$0xff]  }
   0xf   :  { %1550 = vmatpush3.bf16.msra.mxu0 %v1739_v7  ;;  %1723 = vmatpush3.bf16.msra.mxu1 %v1739_v7 }
  0x10   :  { %1551 = vmatprep.subr.bf16.mxu0 %v1740_v8  ;;  %1716 = vmatprep.subr.bf16.mxu1 %v1740_v8 }
  0x13   :  { %1552 = vmatpush3.bf16.msra.mxu0 %v1741_v9  ;;  %1724 = vmatpush3.bf16.msra.mxu1 %v1741_v9 }
  0x14   :  { %1553 = vmatprep.subr.bf16.mxu0 %v1742_v10  ;;  %1717 = vmatprep.subr.bf16.mxu1 %v1742_v10 }
  0x17   :  { %1554 = vmatpush3.bf16.msra.mxu0 %v1743_v13  ;;  %1725 = vmatpush3.bf16.msra.mxu1 %v1743_v13 }
  0x18   :  { %1555 = vmatprep.subr.bf16.mxu0 %v1744_v14  ;;  %1718 = vmatprep.subr.bf16.mxu1 %v1744_v14 }
  0x1b   :  { %1556 = vmatpush3.bf16.msra.mxu0 %v1745_v15  ;;  %1726 = vmatpush3.bf16.msra.mxu1 %v1745_v15 }
  0x1c   :  { %1557 = vmatprep.subr.bf16.mxu0 %v1746_v16  ;;  %1719 = vmatprep.subr.bf16.mxu1 %v1746_v16 }
  0x1f   :  { %1558 = vmatpush3.bf16.msra.mxu0 %v1747_v17  ;;  %1727 = vmatpush3.bf16.msra.mxu1 %v1747_v17 }
  0x20   :  { %1674 = vmatprep.subr.bf16.mxu1 %v1754_v18 }
  0x22   :  { %625 = vmatmul.mubr.bf16.vlgmr.msra.gmra.mrb[0].mxu0 %v1748_v19  ;;  %721 = vmatmul.mubr.bf16.vlgmr.msra.gmra.mrb[0].mxu1 %v1751_v20 }
  0x23   :  { %1675 = vmatpush3.bf16.msra.mxu1 %v1754_v18  ;;  %632 = vmatprep.mubr.bf16.mxu0 %v1755_v21 }
  0x24   :  { %728 = vmatprep.mubr.bf16.mxu1 %v1757_v22  ;;  %1676 = vmatprep.subr.bf16.mxu1 %v1761_v23 }
  0x27   :  { %1677 = vmatpush3.bf16.msra.mxu1 %v1761_v23 }
  0x28   :  { %1728 = vmatprep.subr.msk.bf16.mxu1 %vm588_vm0, %v1772_v25 }
  0x2a   :  { %633 = vmatmul.mubr.bf16.gmra.mrb[4].mxu0 %v1759_v24  ;;  %729 = vmatmul.mubr.bf16.gmra.mrb[4].mxu1 %v1760_v26 }
  0x2b   :  { %640 = vmatprep.mubr.bf16.mxu0 %v1762_v27  ;;  %736 = vmatprep.mubr.bf16.mxu1 %v1764_v28 }
  0x2c   :  { %1679 = vmatpush3.bf16.msra.mxu1 %v590_v29 }
  0x32   :  { %641 = vmatmul.mubr.bf16.gmra.mrb[8].mxu0 %v1766_v30  ;;  %737 = vmatmul.mubr.bf16.gmra.mrb[8].mxu1 %v1767_v31 }
  0x33   :  { %648 = vmatprep.mubr.bf16.mxu0 %v1768_v32  ;;  %744 = vmatprep.mubr.bf16.mxu1 %v1770_v33 }
  0x34   :  { %9 = vsyncpa [#allocation4], 0  ;;  %v1778_v38 = vld [vmem:[%s2200_s0 + $0x60] ss:$12 sps:$4 sm:$0xff]   ;;  %v1780_v40 = vld [vmem:[%s2200_s0 + $0x7c] ss:$12 sps:$4 sm:$0xff]  }
  0x35   :  { %v1779_v39 = vld [vmem:[%s2200_s0 + $0x20] ss:$12 sps:$4 sm:$0xff]   ;;  %v1782_v41 = vld [vmem:[%s2200_s0 + $0x38] ss:$12 sps:$4 sm:$0xff]   ;;  %v1784_v43 = vld [vmem:[%s2200_s0 + $0x50] ss:$12 sps:$4 sm:$0xff]  }
  0x36   :  { %v1783_v42 = vld [vmem:[%s2200_s0 + $0x78] ss:$12 sps:$4 sm:$0xff]   ;;  %v1785_v44 = vld [vmem:[%s2200_s0 + $0x94] ss:$12 sps:$4 sm:$0xff]   ;;  %v1788_v46 = vld [vmem:[%s2200_s0 + $0x90] ss:$12 sps:$4 sm:$0xff]  }
  0x37   :  { %v1787_v45 = vld [vmem:[%s2200_s0 + $0x68] ss:$12 sps:$4 sm:$0xff]   ;;  %v1789_v47 = vld [vmem:[%s2200_s0 + $0x80] ss:$12 sps:$4 sm:$0xff]   ;;  %v1792_v49 = vld [vmem:[%s2200_s0 + $0x98] ss:$12 sps:$4 sm:$0xff]  }
  0x38   :  { %v1790_v48 = vld [vmem:[%s2200_s0 + $0xac] ss:$12 sps:$4 sm:$0xff]   ;;  %v1793_v50 = vld [vmem:[%s2200_s0 + $0xa8] ss:$12 sps:$4 sm:$0xff]   ;;  %v1794_v51 = vld [vmem:[%s2200_s0 + $0xb0] ss:$12 sps:$4 sm:$0xff]  }
  0x39   :  { %v1795_v52 = vld [vmem:[%s2200_s0 + $0xc4] ss:$12 sps:$4 sm:$0xff]   ;;  %v1797_v53 = vld [vmem:[%s2200_s0 + $0xc8] ss:$12 sps:$4 sm:$0xff]   ;;  %v1798_v54 = vld [vmem:[%s2200_s0 + $0xc0] ss:$12 sps:$4 sm:$0xff]  }
  0x3a   :  { %649 = vmatmul.mubr.bf16.gmra.mrb[12].mxu0 %v1773_v34  ;;  %745 = vmatmul.mubr.bf16.gmra.mrb[12].mxu1 %v1774_v35  ;;  %v1799_v55 = vld [vmem:[%s2200_s0 + $0xe0] ss:$12 sps:$4 sm:$0xff]   ;;  %v1800_v56 = vld [vmem:[%s2200_s0 + $0xdc] ss:$12 sps:$4 sm:$0xff]   ;;  %v1802_v57 = vld [vmem:[%s2200_s0 + $0xf8] ss:$12 sps:$4 sm:$0xff]  }
  0x3b   :  { %656 = vmatprep.mubr.bf16.mxu0 %v1775_v36  ;;  %1680 = vmatprep.mubr.msk.bf16.mxu1 %vm539_vm1, %v1777_v37  ;;  %v1803_v58 = vld [vmem:[%s2200_s0 + $0xd8] ss:$12 sps:$4 sm:$0xff]   ;;  %v1804_v59 = vld [vmem:[%s2200_s0 + $0x110] ss:$12 sps:$4 sm:$0xff]   ;;  %v1805_v60 = vld [vmem:[%s2200_s0 + $0xf4] ss:$12 sps:$4 sm:$0xff]  }
  0x3c   :  { %v1807_v61 = vld [vmem:[%s2200_s0 + $0x128] ss:$12 sps:$4 sm:$0xff]   ;;  %v1808_v62 = vld [vmem:[%s2200_s0 + $0xf0] ss:$12 sps:$4 sm:$0xff]   ;;  %v1809_v63 = vld [vmem:[%s2200_s0 + $0x140] ss:$12 sps:$4 sm:$0xff]  }
  0x3d   :  { %v1810_v0 = vld [vmem:[%s2200_s0 + $0x10c] ss:$12 sps:$4 sm:$0xff]   ;;  %v1813_v2 = vld [vmem:[%s2200_s0 + $0x108] ss:$12 sps:$4 sm:$0xff]   ;;  %v1814_v3 = vld [vmem:[%s2200_s0 + $0x170] ss:$12 sps:$4 sm:$0xff]  }
  0x3e   :  { %v1812_v1 = vld [vmem:[%s2200_s0 + $0x158] ss:$12 sps:$4 sm:$0xff]  }
  0x42   :  { %657 = vmatmul.mubr.bf16.gmra.mrb[16].mxu0 %v1778_v38  ;;  %1681 = vmatmul.mubr.msk.bf16.vlgmr.msra.gmra.mrb[16].mxu1 %vm539_vm1, %v1779_v39 }
  0x43   :  { %664 = vmatprep.mubr.bf16.mxu0 %v1780_v40  ;;  %1684 = vmatprep.mubr.msk.bf16.mxu1 %vm539_vm1, %v1782_v41 }
  0x4a   :  { %665 = vmatmul.mubr.bf16.gmra.mrb[20].mxu0 %v1783_v42  ;;  %1685 = vmatmul.mubr.msk.bf16.gmra.mrb[20].mxu1 %vm539_vm1, %v1784_v43 }
  0x4b   :  { %672 = vmatprep.mubr.bf16.mxu0 %v1785_v44  ;;  %1688 = vmatprep.mubr.msk.bf16.mxu1 %vm539_vm1, %v1787_v45 }
  0x52   :  { %673 = vmatmul.mubr.bf16.gmra.mrb[24].mxu0 %v1788_v46  ;;  %1689 = vmatmul.mubr.msk.bf16.gmra.mrb[24].mxu1 %vm539_vm1, %v1789_v47 }
  0x53   :  { %680 = vmatprep.mubr.bf16.mxu0 %v1790_v48  ;;  %1692 = vmatprep.mubr.msk.bf16.mxu1 %vm539_vm1, %v1792_v49 }
  0x5a   :  { %681 = vmatmul.mubr.bf16.gmra.mrb[28].mxu0 %v1793_v50  ;;  %1693 = vmatmul.mubr.msk.bf16.gmra.mrb[28].mxu1 %vm539_vm1, %v1794_v51 }
  0x5b   :  { %688 = vmatprep.mubr.bf16.mxu0 %v1795_v52  ;;  %1696 = vmatprep.mubr.msk.bf16.mxu1 %vm539_vm1, %v1797_v53 }
  0x62   :  { %689 = vmatmul.mubr.bf16.gmra.mrb[32].mxu0 %v1798_v54  ;;  %1697 = vmatmul.mubr.msk.bf16.gmra.mrb[32].mxu1 %vm539_vm1, %v1799_v55  ;;  %v2103_v54 = vld [vmem:[%s2202_s2] ss:$0 sm:$0xff]  ;;  %s1839_s2 = smov [#allocation3]  }
  0x63   :  { %696 = vmatprep.mubr.bf16.mxu0 %v1800_v56  ;;  %1700 = vmatprep.mubr.msk.bf16.mxu1 %vm539_vm1, %v1802_v57 }
  0x6a   :  { %697 = vmatmul.mubr.bf16.gmra.mrb[36].mxu0 %v1803_v58  ;;  %1701 = vmatmul.mubr.msk.bf16.gmra.mrb[36].mxu1 %vm539_vm1, %v1804_v59  ;;  %v2108_v58 = vld [vmem:[%s2203_s3] ss:$0 sm:$0xff]  ;;  %s1288_s3 = sshll.u32 %s1839_s2, 4  ;;  %s1289_s3 = int_to_ptr.vmem [resolvable:$true] %s1288_s3 }
  0x6b   :  { %704 = vmatprep.mubr.bf16.mxu0 %v1805_v60  ;;  %1704 = vmatprep.mubr.msk.bf16.mxu1 %vm539_vm1, %v1807_v61  ;;  %s1815_s19 = scalar_lea.vmem %s1289_s3, 2048  ;;  %p1820_p1 = scmp.lt.s32.totalorder %s1289_s3, %s1289_s3 }
  0x6c   :  { %p1816_p0 = scmp.ne.s32.totalorder %s1289_s3, %s1815_s19  ;;  %p1821_p2 = scmp.lt.s32.totalorder %s1815_s19, %s1815_s19 }
  0x6e   :  { %p1822_p3 = por %p1821_p2, %p1820_p1 }
  0x70   :  { %p1823_p4 = pnand %p1822_p3, %p1816_p0 }
  0x72   :  { %705 = vmatmul.mubr.bf16.gmra.mrb[40].mxu0 %v1808_v62  ;;  %1705 = vmatmul.mubr.msk.bf16.gmra.mrb[40].mxu1 %vm539_vm1, %v1809_v63 }
  0x73   :  { %712 = vmatprep.mubr.bf16.mxu0 %v1810_v0  ;;  %1708 = vmatprep.mubr.msk.bf16.mxu1 %vm539_vm1, %v1812_v1 }
  0x7a   :  { %713 = vmatmul.mubr.bf16.gmra.mrb[44].mxu0 %v1813_v2  ;;  %1709 = vmatmul.mubr.msk.bf16.gmra.mrb[44].mxu1 %vm539_vm1, %v1814_v3 }
  0xf5   :  { %v1559_v4 = vpop.f32.mrb[0].mxu0  ;;  %v1631_v5 = vpop.f32.mrb[0].mxu1 }
  0xf6   :  { %v1560_v6 = vpop.f32.mrb[1].mxu0  ;;  %v1632_v7 = vpop.f32.mrb[1].mxu1 }
  0xf7   :  { %v1561_v8 = vadd.f32 %v1560_v6, %v1559_v4  ;;  %v2084_v9 = vadd.f32 %v1632_v7, %v1631_v5  ;;  %v1562_v10 = vpop.f32.mrb[2].mxu0  ;;  %v1634_v11 = vpop.f32.mrb[2].mxu1 }
  0xf8   :  { %v1563_v12 = vpop.f32.mrb[3].mxu0  ;;  %v1635_v13 = vpop.f32.mrb[3].mxu1 }
  0xf9   :  { %v1564_v14 = vadd.f32 %v1563_v12, %v1562_v10  ;;  %v2086_v15 = vadd.f32 %v1635_v13, %v1634_v11 }
  0xfd   :  { %v1565_v16 = vpop.f32.mrb[4].mxu0  ;;  %v1637_v17 = vpop.f32.mrb[4].mxu1 }
  0xfe   :  { %v1566_v18 = vpop.f32.mrb[5].mxu0  ;;  %v1638_v19 = vpop.f32.mrb[5].mxu1 }
  0xff   :  { %v1567_v20 = vadd.f32 %v1566_v18, %v1565_v16  ;;  %v2088_v21 = vadd.f32 %v1638_v19, %v1637_v17  ;;  %v1568_v22 = vpop.f32.mrb[6].mxu0  ;;  %v1640_v23 = vpop.f32.mrb[6].mxu1 }
 0x100   :  { %v1569_v24 = vpop.f32.mrb[7].mxu0  ;;  %v1641_v25 = vpop.f32.mrb[7].mxu1 }
 0x101   :  { %v1570_v26 = vadd.f32 %v1569_v24, %v1568_v22  ;;  %v2090_v27 = vadd.f32 %v1641_v25, %v1640_v23 }
 0x105   :  { %v1571_v28 = vpop.f32.mrb[8].mxu0  ;;  %v1643_v29 = vpop.f32.mrb[8].mxu1 }
 0x106   :  { %v1572_v30 = vpop.f32.mrb[9].mxu0  ;;  %v1644_v31 = vpop.f32.mrb[9].mxu1 }
 0x107   :  { %v1573_v32 = vadd.f32 %v1572_v30, %v1571_v28  ;;  %v2092_v33 = vadd.f32 %v1644_v31, %v1643_v29  ;;  %v1574_v34 = vpop.f32.mrb[10].mxu0  ;;  %v1646_v35 = vpop.f32.mrb[10].mxu1 }
 0x108   :  { %v1575_v36 = vpop.f32.mrb[11].mxu0  ;;  %v1647_v37 = vpop.f32.mrb[11].mxu1 }
 0x109   :  { %v1576_v38 = vadd.f32 %v1575_v36, %v1574_v34  ;;  %v2094_v39 = vadd.f32 %v1647_v37, %v1646_v35 }
 0x10d   :  { %v1577_v40 = vpop.f32.mrb[12].mxu0  ;;  %v1649_v41 = vpop.f32.mrb[12].mxu1 }
 0x10e   :  { %v1578_v42 = vpop.f32.mrb[13].mxu0  ;;  %v1650_v43 = vpop.f32.mrb[13].mxu1 }
 0x10f   :  { %v1579_v44 = vadd.f32 %v1578_v42, %v1577_v40  ;;  %v2096_v45 = vadd.f32 %v1650_v43, %v1649_v41  ;;  %v1580_v46 = vpop.f32.mrb[14].mxu0  ;;  %v1652_v47 = vpop.f32.mrb[14].mxu1 }
 0x110   :  { %v1581_v48 = vpop.f32.mrb[15].mxu0  ;;  %v1653_v49 = vpop.f32.mrb[15].mxu1 }
 0x111   :  { %v1582_v50 = vadd.f32 %v1581_v48, %v1580_v46  ;;  %v2098_v51 = vadd.f32 %v1653_v49, %v1652_v47 }
 0x115   :  { %v1583_v52 = vpop.f32.mrb[16].mxu0  ;;  %v1682_v53 = vpop.f32.mrb[16].mxu1 }
 0x116   :  { %v796_v55 = vadd.f32 %v1682_v53, %v1567_v20  ;;  %v1584_v56 = vpop.f32.mrb[17].mxu0  ;;  %v787_v57 = vpop.f32.mrb[17].mxu1 }
 0x117   :  { %v1585_v59 = vadd.f32 %v1584_v56, %v1583_v52  ;;  %v788_v60 = vadd.f32 %v1561_v8, %v787_v57  ;;  %v1586_v61 = vpop.f32.mrb[18].mxu0  ;;  %v1683_v62 = vpop.f32.mrb[18].mxu1 }
 0x118   :  { %v1022_v63 = vmul.f32 %v2103_v54, %v796_v55  ;;  %v799_v0 = vadd.f32 %v1683_v62, %v1570_v26  ;;  %v1587_v1 = vpop.f32.mrb[19].mxu0  ;;  %v790_v2 = vpop.f32.mrb[19].mxu1 }
 0x119   :  { %v1020_v3 = vmul.f32 %v2103_v54, %v788_v60  ;;  %v1588_v4 = vadd.f32 %v1587_v1, %v1586_v61  ;;  %v791_v5 = vadd.f32 %v1564_v14, %v790_v2 }
 0x11a   :  { %v1061_v6 = vadd.f32 %v2108_v58, %v1022_v63  ;;  %v1023_v7 = vmul.f32 %v2103_v54, %v799_v0 }
 0x11b   :  { %v1059_v10 = vadd.f32 %v2108_v58, %v1020_v3  ;;  %v1021_v11 = vmul.f32 %v2103_v54, %v791_v5 }
 0x11c   :  { %v1062_v8 = vadd.f32 %v2108_v58, %v1023_v7  ;;  %v1093_v17 = vmax.f32 %v1061_v6, 0.0 }
 0x11d   :  { %v1060_v12 = vadd.f32 %v2108_v58, %v1021_v11  ;;  %v1589_v13 = vpop.f32.mrb[20].mxu0  ;;  %v1686_v16 = vpop.f32.mrb[20].mxu1  ;;  %v1091_v14 = vmax.f32 %v1059_v10, 0.0 }
 0x11e   :  { %v1094_v18 = vmax.f32 %v1062_v8, 0.0  ;;  %v812_v19 = vadd.f32 %v1686_v16, %v1579_v44  ;;  %v1590_v20 = vpop.f32.mrb[21].mxu0  ;;  %v803_v22 = vpop.f32.mrb[21].mxu1 }
 0x11f   :  { %v1092_v23 = vmax.f32 %v1060_v12, 0.0  ;;  %v1591_v24 = vadd.f32 %v1590_v20, %v1589_v13  ;;  %v804_v25 = vadd.f32 %v1573_v32, %v803_v22  ;;  %v1592_v26 = vpop.f32.mrb[22].mxu0  ;;  %v1687_v28 = vpop.f32.mrb[22].mxu1 }
 0x120   :  { %v1456_v29 = vpack.c.bf16 %v1094_v18, %v1093_v17  ;;  %v1026_v30 = vmul.f32 %v2103_v54, %v812_v19  ;;  %v815_v31 = vadd.f32 %v1687_v28, %v1582_v50  ;;  %v1593_v34 = vpop.f32.mrb[23].mxu0  ;;  %v806_v35 = vpop.f32.mrb[23].mxu1 }
 0x121   :  { %v1451_v36 = vpack.c.bf16 %v1092_v23, %v1091_v14  ;;  %v1024_v37 = vmul.f32 %v2103_v54, %v804_v25  ;;  %v1594_v40 = vadd.f32 %v1593_v34, %v1592_v26  ;;  %v807_v41 = vadd.f32 %v1576_v38, %v806_v35 }
 0x122   :  { %1528 = vst [vmem:[#allocation3 + $0x8] sm:$0xff] %v1456_v29   ;;  %v1065_v42 = vadd.f32 %v2108_v58, %v1026_v30  ;;  %v1027_v43 = vmul.f32 %v2103_v54, %v815_v31 }
 0x123   :  { %1452 = vst [vmem:[#allocation3] sm:$0xff] %v1451_v36   ;;  %v1063_v32 = vadd.f32 %v2108_v58, %v1024_v37  ;;  %v1025_v44 = vmul.f32 %v2103_v54, %v807_v41 }
 0x124   :  { %v1066_v46 = vadd.f32 %v2108_v58, %v1027_v43  ;;  %v1097_v50 = vmax.f32 %v1065_v42, 0.0 }
 0x125   :  { %v1064_v47 = vadd.f32 %v2108_v58, %v1025_v44  ;;  %v1595_v48 = vpop.f32.mrb[24].mxu0  ;;  %v1690_v49 = vpop.f32.mrb[24].mxu1  ;;  %v1095_v56 = vmax.f32 %v1063_v32, 0.0 }
 0x126   :  { %v1098_v52 = vmax.f32 %v1066_v46, 0.0  ;;  %v828_v53 = vadd.f32 %v1690_v49, %v1591_v24  ;;  %v1596_v38 = vpop.f32.mrb[25].mxu0  ;;  %v819_v55 = vpop.f32.mrb[25].mxu1 }
 0x127   :  { %v1096_v57 = vmax.f32 %v1064_v47, 0.0  ;;  %v1597_v60 = vadd.f32 %v1596_v38, %v1595_v48  ;;  %v820_v61 = vadd.f32 %v1585_v59, %v819_v55  ;;  %v1598_v62 = vpop.f32.mrb[26].mxu0  ;;  %v1691_v63 = vpop.f32.mrb[26].mxu1 }
 0x128   :  { %v1466_v0 = vpack.c.bf16 %v1098_v52, %v1097_v50  ;;  %v1030_v1 = vmul.f32 %v2103_v54, %v828_v53  ;;  %v831_v2 = vadd.f32 %v1691_v63, %v1594_v40  ;;  %v1599_v3 = vpop.f32.mrb[27].mxu0  ;;  %v822_v5 = vpop.f32.mrb[27].mxu1 }
 0x129   :  { %v1461_v6 = vpack.c.bf16 %v1096_v57, %v1095_v56  ;;  %v1028_v7 = vmul.f32 %v2103_v54, %v820_v61  ;;  %v1600_v10 = vadd.f32 %v1599_v3, %v1598_v62  ;;  %v823_v11 = vadd.f32 %v1588_v4, %v822_v5 }
 0x12a   :  { %1530 = vst [vmem:[#allocation3 + $0x18] sm:$0xff] %v1466_v0   ;;  %v1069_v8 = vadd.f32 %v2108_v58, %v1030_v1  ;;  %v1031_v12 = vmul.f32 %v2103_v54, %v831_v2 }
 0x12b   :  { %1529 = vst [vmem:[#allocation3 + $0x10] sm:$0xff] %v1461_v6   ;;  %v1067_v59 = vadd.f32 %v2108_v58, %v1028_v7  ;;  %v1029_v13 = vmul.f32 %v2103_v54, %v823_v11 }
 0x12c   :  { %v1070_v16 = vadd.f32 %v2108_v58, %v1031_v12  ;;  %v1101_v20 = vmax.f32 %v1069_v8, 0.0 }
 0x12d   :  { %v1068_v17 = vadd.f32 %v2108_v58, %v1029_v13  ;;  %v1601_v18 = vpop.f32.mrb[28].mxu0  ;;  %v1694_v19 = vpop.f32.mrb[28].mxu1  ;;  %v1099_v23 = vmax.f32 %v1067_v59, 0.0 }
 0x12e   :  { %v1102_v22 = vmax.f32 %v1070_v16, 0.0  ;;  %v1602_v14 = vpop.f32.mrb[29].mxu0  ;;  %v835_v4 = vpop.f32.mrb[29].mxu1 }
 0x12f   :  { %v1100_v24 = vmax.f32 %v1068_v17, 0.0  ;;  %v1603_v25 = vadd.f32 %v1602_v14, %v1601_v18  ;;  %v836_v26 = vadd.f32 %v1597_v60, %v835_v4  ;;  %v1604_v28 = vpop.f32.mrb[30].mxu0  ;;  %v1695_v29 = vpop.f32.mrb[30].mxu1 }
 0x130   :  { %v1476_v30 = vpack.c.bf16 %v1102_v22, %v1101_v20  ;;  %v1605_v31 = vpop.f32.mrb[31].mxu0  ;;  %v838_v34 = vpop.f32.mrb[31].mxu1 }
 0x131   :  { %v1471_v35 = vpack.c.bf16 %v1100_v24, %v1099_v23  ;;  %v844_v36 = vadd.f32 %v1694_v19, %v1603_v25  ;;  %v1032_v37 = vmul.f32 %v2103_v54, %v836_v26  ;;  %v1606_v40 = vadd.f32 %v1605_v31, %v1604_v28 }
 0x132   :  { %1532 = vst [vmem:[#allocation3 + $0x28] sm:$0xff] %v1476_v30   ;;  %v839_v41 = vadd.f32 %v1600_v10, %v838_v34 }
 0x133   :  { %1531 = vst [vmem:[#allocation3 + $0x20] sm:$0xff] %v1471_v35   ;;  %v1034_v42 = vmul.f32 %v2103_v54, %v844_v36  ;;  %v847_v43 = vadd.f32 %v1695_v29, %v1606_v40  ;;  %v1071_v32 = vadd.f32 %v2108_v58, %v1032_v37 }
 0x134   :  { %v1033_v44 = vmul.f32 %v2103_v54, %v839_v41 }
 0x135   :  { %v1073_v46 = vadd.f32 %v2108_v58, %v1034_v42  ;;  %v1035_v47 = vmul.f32 %v2103_v54, %v847_v43  ;;  %v1607_v48 = vpop.f32.mrb[32].mxu0  ;;  %v1698_v49 = vpop.f32.mrb[32].mxu1  ;;  %v1103_v60 = vmax.f32 %v1071_v32, 0.0 }
 0x136   :  { %v1072_v50 = vadd.f32 %v2108_v58, %v1033_v44  ;;  %v1608_v52 = vpop.f32.mrb[33].mxu0  ;;  %v851_v53 = vpop.f32.mrb[33].mxu1 }
 0x137   :  { %v1074_v38 = vadd.f32 %v2108_v58, %v1035_v47  ;;  %v1609_v55 = vadd.f32 %v1608_v52, %v1607_v48  ;;  %v1610_v56 = vpop.f32.mrb[34].mxu0  ;;  %v1699_v57 = vpop.f32.mrb[34].mxu1  ;;  %v1105_v0 = vmax.f32 %v1073_v46, 0.0 }
 0x138   :  { %v1104_v61 = vmax.f32 %v1072_v50, 0.0  ;;  %v1611_v62 = vpop.f32.mrb[35].mxu0  ;;  %v854_v63 = vpop.f32.mrb[35].mxu1 }
 0x139   :  { %v1106_v1 = vmax.f32 %v1074_v38, 0.0  ;;  %v852_v2 = vadd.f32 %v1609_v55, %v851_v53  ;;  %v1612_v3 = vadd.f32 %v1611_v62, %v1610_v56 }
 0x13a   :  { %v1481_v5 = vpack.c.bf16 %v1104_v61, %v1103_v60 }
 0x13b   :  { %v1486_v6 = vpack.c.bf16 %v1106_v1, %v1105_v0  ;;  %v1036_v7 = vmul.f32 %v2103_v54, %v852_v2  ;;  %v855_v10 = vadd.f32 %v1612_v3, %v854_v63 }
 0x13c   :  { %1533 = vst [vmem:[#allocation3 + $0x30] sm:$0xff] %v1481_v5  }
 0x13d   :  { %1534 = vst [vmem:[#allocation3 + $0x38] sm:$0xff] %v1486_v6   ;;  %v1075_v11 = vadd.f32 %v2108_v58, %v1036_v7  ;;  %v1037_v8 = vmul.f32 %v2103_v54, %v855_v10  ;;  %v1613_v12 = vpop.f32.mrb[36].mxu0  ;;  %v2145_v59 = vpop.f32.mrb[36].mxu1 }
 0x13e   :  { %v1614_v13 = vpop.f32.mrb[37].mxu0  ;;  %v867_v16 = vpop.f32.mrb[37].mxu1 }
 0x13f   :  { %v1076_v17 = vadd.f32 %v2108_v58, %v1037_v8  ;;  %v1615_v18 = vadd.f32 %v1614_v13, %v1613_v12  ;;  %v1616_v19 = vpop.f32.mrb[38].mxu0  ;;  %v2148_v20 = vpop.f32.mrb[38].mxu1  ;;  %v1107_v4 = vmax.f32 %v1075_v11, 0.0 }
 0x140   :  { %v1617_v22 = vpop.f32.mrb[39].mxu0  ;;  %v870_v14 = vpop.f32.mrb[39].mxu1 }
 0x141   :  { %v1108_v23 = vmax.f32 %v1076_v17, 0.0  ;;  %v860_v24 = vadd.f32 %v1698_v49, %v1615_v18  ;;  %v1618_v25 = vadd.f32 %v1617_v22, %v1616_v19 }
 0x143   :  { %v1491_v26 = vpack.c.bf16 %v1108_v23, %v1107_v4  ;;  %v1038_v28 = vmul.f32 %v2103_v54, %v860_v24  ;;  %v863_v29 = vadd.f32 %v1699_v57, %v1618_v25 }
 0x145   :  { %1535 = vst [vmem:[#allocation3 + $0x40] sm:$0xff] %v1491_v26   ;;  %v1077_v30 = vadd.f32 %v2108_v58, %v1038_v28  ;;  %v1039_v31 = vmul.f32 %v2103_v54, %v863_v29  ;;  %v1619_v34 = vpop.f32.mrb[40].mxu0  ;;  %v1706_v35 = vpop.f32.mrb[40].mxu1 }
 0x146   :  { %v892_v36 = vadd.f32 %v1706_v35, %v2088_v21  ;;  %v1620_v37 = vpop.f32.mrb[41].mxu0  ;;  %v883_v40 = vpop.f32.mrb[41].mxu1 }
 0x147   :  { %v1078_v41 = vadd.f32 %v2108_v58, %v1039_v31  ;;  %v1621_v42 = vadd.f32 %v1620_v37, %v1619_v34  ;;  %v884_v43 = vadd.f32 %v2084_v9, %v883_v40  ;;  %v1622_v32 = vpop.f32.mrb[42].mxu0  ;;  %v1707_v44 = vpop.f32.mrb[42].mxu1  ;;  %v1109_v46 = vmax.f32 %v1077_v30, 0.0 }
 0x148   :  { %v1046_v47 = vmul.f32 %v2103_v54, %v892_v36  ;;  %v895_v48 = vadd.f32 %v1707_v44, %v2090_v27  ;;  %v1623_v49 = vpop.f32.mrb[43].mxu0  ;;  %v886_v50 = vpop.f32.mrb[43].mxu1 }
 0x149   :  { %v1110_v52 = vmax.f32 %v1078_v41, 0.0  ;;  %v868_v53 = vadd.f32 %v1621_v42, %v867_v16  ;;  %v1044_v21 = vmul.f32 %v2103_v54, %v884_v43  ;;  %v1624_v38 = vadd.f32 %v1623_v49, %v1622_v32 }
 0x14a   :  { %v1085_v55 = vadd.f32 %v2108_v58, %v1046_v47  ;;  %v1047_v56 = vmul.f32 %v2103_v54, %v895_v48  ;;  %v887_v9 = vadd.f32 %v2086_v15, %v886_v50 }
 0x14b   :  { %v1496_v57 = vpack.c.bf16 %v1110_v52, %v1109_v46  ;;  %v1040_v60 = vmul.f32 %v2103_v54, %v868_v53  ;;  %v1083_v61 = vadd.f32 %v2108_v58, %v1044_v21  ;;  %v871_v62 = vadd.f32 %v1624_v38, %v870_v14 }
 0x14c   :  { %v1086_v27 = vadd.f32 %v2108_v58, %v1047_v56  ;;  %v1045_v63 = vmul.f32 %v2103_v54, %v887_v9  ;;  %v1117_v0 = vmax.f32 %v1085_v55, 0.0 }
 0x14d   :  { %1536 = vst [vmem:[#allocation3 + $0x48] sm:$0xff] %v1496_v57   ;;  %v1079_v1 = vadd.f32 %v2108_v58, %v1040_v60  ;;  %v1041_v2 = vmul.f32 %v2103_v54, %v871_v62  ;;  %v1625_v3 = vpop.f32.mrb[44].mxu0  ;;  %v1710_v5 = vpop.f32.mrb[44].mxu1  ;;  %v1115_v6 = vmax.f32 %v1083_v61, 0.0 }
 0x14e   :  { %v1118_v15 = vmax.f32 %v1086_v27, 0.0  ;;  %v1084_v7 = vadd.f32 %v2108_v58, %v1045_v63  ;;  %v908_v10 = vadd.f32 %v1710_v5, %v2096_v45  ;;  %v1626_v11 = vpop.f32.mrb[45].mxu0  ;;  %v899_v8 = vpop.f32.mrb[45].mxu1 }
 0x14f   :  { %v1111_v12 = vmax.f32 %v1079_v1, 0.0  ;;  %v1080_v13 = vadd.f32 %v2108_v58, %v1041_v2  ;;  %v1627_v16 = vadd.f32 %v1626_v11, %v1625_v3  ;;  %v900_v17 = vadd.f32 %v2092_v33, %v899_v8  ;;  %v1628_v18 = vpop.f32.mrb[46].mxu0  ;;  %v1711_v19 = vpop.f32.mrb[46].mxu1 }
 0x150   :  { %v1516_v22 = vpack.c.bf16 %v1118_v15, %v1117_v0  ;;  %v1116_v14 = vmax.f32 %v1084_v7, 0.0  ;;  %v1050_v4 = vmul.f32 %v2103_v54, %v908_v10  ;;  %v911_v23 = vadd.f32 %v1711_v19, %v2098_v51  ;;  %v1629_v24 = vpop.f32.mrb[47].mxu0  ;;  %v902_v25 = vpop.f32.mrb[47].mxu1 }
 0x151   :  { %v1112_v26 = vmax.f32 %v1080_v13, 0.0  ;;  %v876_v45 = vadd.f32 %v2145_v59, %v1627_v16  ;;  %v1048_v28 = vmul.f32 %v2103_v54, %v900_v17  ;;  %v1630_v29 = vadd.f32 %v1629_v24, %v1628_v18 }
 0x152   :  { %1540 = vst [vmem:[#allocation3 + $0x68] sm:$0xff] %v1516_v22   ;;  %v1511_v30 = vpack.c.bf16 %v1116_v14, %v1115_v6  ;;  %v1089_v33 = vadd.f32 %v2108_v58, %v1050_v4  ;;  %v1051_v31 = vmul.f32 %v2103_v54, %v911_v23  ;;  %v903_v34 = vadd.f32 %v2094_v39, %v902_v25 }
 0x153   :  { %v1501_v35 = vpack.c.bf16 %v1112_v26, %v1111_v12  ;;  %v1042_v36 = vmul.f32 %v2103_v54, %v876_v45  ;;  %v879_v51 = vadd.f32 %v2148_v20, %v1630_v29  ;;  %v1087_v37 = vadd.f32 %v2108_v58, %v1048_v28 }
 0x154   :  { %1539 = vst [vmem:[#allocation3 + $0x60] sm:$0xff] %v1511_v30   ;;  %v1090_v59 = vadd.f32 %v2108_v58, %v1051_v31  ;;  %v1049_v40 = vmul.f32 %v2103_v54, %v903_v34  ;;  %v1121_v43 = vmax.f32 %v1089_v33, 0.0 }
 0x155   :  { %1537 = vst [vmem:[#allocation3 + $0x50] sm:$0xff] %v1501_v35   ;;  %v1081_v41 = vadd.f32 %v2108_v58, %v1042_v36  ;;  %v1043_v42 = vmul.f32 %v2103_v54, %v879_v51  ;;  %v1119_v46 = vmax.f32 %v1087_v37, 0.0 }
 0x156   :  { %v1122_v32 = vmax.f32 %v1090_v59, 0.0  ;;  %v1088_v39 = vadd.f32 %v2108_v58, %v1049_v40 }
 0x157   :  { %v1082_v44 = vadd.f32 %v2108_v58, %v1043_v42  ;;  %v1113_v48 = vmax.f32 %v1081_v41, 0.0 }
 0x158   :  { %v1526_v20 = vpack.c.bf16 %v1122_v32, %v1121_v43  ;;  %v1120_v47 = vmax.f32 %v1088_v39, 0.0 }
 0x159   :  { %v1114_v49 = vmax.f32 %v1082_v44, 0.0 }
 0x15a   :  { %1542 = vst [vmem:[#allocation3 + $0x78] sm:$0xff] %v1526_v20   ;;  %v1521_v50 = vpack.c.bf16 %v1120_v47, %v1119_v46 }
 0x15b   :  { %v1506_v52 = vpack.c.bf16 %v1114_v49, %v1113_v48 }
 0x15c   :  { %1541 = vst [vmem:[#allocation3 + $0x70] sm:$0xff] %v1521_v50  }
 0x15d   :  { %1538 = vst [vmem:[#allocation3 + $0x58] sm:$0xff] %v1506_v52  }
 0x15e   :  { %1826 = shalt.err (!%p1823_p4)
}
 0x15f   :  { %s1827_s21 = scalar_lea.hbm %s2204_s4, 2048 }
 0x160   :  { %p1828_p5 = scmp.ne.s32.totalorder %s2204_s4, %s1827_s21  ;;  %p1831_p6 = scmp.lt.u32.totalorder %s1827_s21, %s2204_s4 }
 0x162   :  { %p1833_p7 = pnand %p1831_p6, %p1828_p5 }
 0x164   :  { %1836 = shalt.err (!%p1833_p7)
}
 0x165   :  { %s1840_s26 = smov 64   ;;  %s1841_s27 = smov 4  }
 0x166   :  { %1294 = dma.vmem_to_hbm [thread:$0]  %s1289_s3, 2048, %s2204_s4, [#allocation4], %s1840_s26, %s1840_s26, %s1841_s27  }
 0x167   :  { %1837 = dma.done.wait [#allocation4], 2048  }
 0x168   :  { %1838 = vsyncadd [#allocation4], 4294965248 }
 0x169   :  { %1298 = vsyncpa [#allocation4], 1 }

</bundles_post_ra>
